<compile_context>
chip_gen: v7x
topology: tpu7x:2x2x1
jax: 0.10.0
libtpu: 0.0.40
codegen_flags: <defaults>
</compile_context>

<pallas_src>
import functools

import jax
import jax.numpy as jnp
from jax import lax
from jax.experimental import pallas as pl
from jax.experimental.pallas import tpu as pltpu


def _qkv_kernel(x_ref, w_ref, o_ref, *, compute_dtype):
    """One row tile: out = x_tile @ W_fused^T (f32 accumulation on the MXU)."""
    x = x_ref[...].astype(compute_dtype)                  # (tm, D)
    w = w_ref[...]                                        # (d_out, D), compute dtype
    o = lax.dot_general(x, w, (((1,), (1,)), ((), ())),
                        preferred_element_type=jnp.float32)
    o_ref[...] = o.astype(o_ref.dtype)


def _qkv_kfac_kernel(x_ref, w_ref, o_ref, st_ref, *, compute_dtype, inv_m):
    """Projection + K-FAC input statistic accumulated in the resident (D, D)
    output block.  x is read from HBM exactly once for both computations."""
    i = pl.program_id(0)
    x = x_ref[...]                                        # (tm, D), original dtype (f32)
    w = w_ref[...]                                        # (d_out, D), compute dtype
    o = lax.dot_general(x.astype(compute_dtype), w, (((1,), (1,)), ((), ())),
                        preferred_element_type=jnp.float32)
    o_ref[...] = o.astype(o_ref.dtype)

    # Statistic stays in f32 (accuracy matters; it is a tiny (D, D) matmul).
    part = lax.dot_general(x, x, (((0,), (0,)), ((), ())),
                           preferred_element_type=jnp.float32)

    @pl.when(i == 0)
    def _():
        st_ref[...] = part

    @pl.when(i > 0)
    def _():
        st_ref[...] += part

    @pl.when(i == pl.num_programs(0) - 1)
    def _():
        st_ref[...] *= jnp.float32(inv_m)                 # mean over (batch, length)


def qkv_linear_forward(x, weights, *, forward_st=None, k=1.0, exp_eps=0.95,
                       kp_forward=False, compute_dtype=jnp.bfloat16,
                       block_m=256):
    """Pallas forward for QKVLinear.

    x       : (B, L, dmodel) float32.
    weights : tuple of nn.Linear weights, each (d_i, dmodel), in the order the
              PyTorch module concatenates them (q, k, v / k, v / q).
    Returns out (B, L, sum(d_i)); when kp_forward=True also returns the
    updated (forward_st, k) functionally.
    """
    B, L, D = x.shape
    w = jnp.concatenate(weights, axis=0) if len(weights) > 1 else weights[0]
    d_out = w.shape[0]
    # Cast the fused weights ONCE outside the kernel: halves the weight DMA and
    # VMEM footprint on the bf16 MXU path.
    w = w.astype(compute_dtype)

    M = B * L
    x2 = x.reshape(M, D)                                  # lane-dense rows; free reshape

    # Row tile: multiple of 8 (sublane), rows padded with zeros up to a tile
    # multiple.  Zero rows contribute nothing to the statistic and their
    # projection rows are sliced off.
    tm = min(block_m, M)
    tm = ((tm + 7) // 8) * 8
    m_pad = ((M + tm - 1) // tm) * tm
    if m_pad != M:
        x2 = jnp.pad(x2, ((0, m_pad - M), (0, 0)))
    num_tiles = m_pad // tm

    # Explicit VMEM budget (v7x: 64 MiB/TC): double-buffered x / W / out tiles
    # plus the resident statistic block, with headroom.
    cbytes = jnp.dtype(compute_dtype).itemsize
    vmem_est = (2 * tm * D * 4            # x tile (f32), double-buffered
                + 2 * d_out * D * cbytes  # fused weights
                + 2 * tm * d_out * 4      # out tile
                + D * D * 4)              # resident statistic block
    vmem_limit = int(min(max(4 * vmem_est, 16 * 1024 * 1024), 48 * 1024 * 1024))

    in_specs = [
        pl.BlockSpec((tm, D), lambda i: (i, 0)),          # x row tile
        pl.BlockSpec((d_out, D), lambda i: (0, 0)),       # fused weights (same block every step)
    ]
    out_spec = pl.BlockSpec((tm, d_out), lambda i: (i, 0))

    if kp_forward:
        assert forward_st is not None
        kernel = functools.partial(_qkv_kfac_kernel, compute_dtype=compute_dtype,
                                   inv_m=1.0 / M)
        out2, st = pl.pallas_call(
            kernel,
            out_shape=(jax.ShapeDtypeStruct((m_pad, d_out), x.dtype),
                       jax.ShapeDtypeStruct((D, D), jnp.float32)),
            grid_spec=pltpu.PrefetchScalarGridSpec(
                num_scalar_prefetch=0,
                grid=(num_tiles,),
                in_specs=in_specs,
                out_specs=(out_spec,
                           pl.BlockSpec((D, D), lambda i: (0, 0)))),
            compiler_params=pltpu.CompilerParams(
                dimension_semantics=("arbitrary",),       # resident accumulator on this axis
                vmem_limit_bytes=vmem_limit),
        )(x2, w)
        if m_pad != M:
            out2 = out2[:M]
        eps = jnp.minimum(1.0 - 1.0 / k, exp_eps)
        new_forward_st = eps * forward_st + (1.0 - eps) * st
        return out2.reshape(B, L, d_out), new_forward_st, k + 1.0

    kernel = functools.partial(_qkv_kernel, compute_dtype=compute_dtype)
    out2 = pl.pallas_call(
        kernel,
        out_shape=jax.ShapeDtypeStruct((m_pad, d_out), x.dtype),
        grid_spec=pltpu.PrefetchScalarGridSpec(
            num_scalar_prefetch=0,
            grid=(num_tiles,),
            in_specs=in_specs,
            out_specs=out_spec),
        compiler_params=pltpu.CompilerParams(
            dimension_semantics=("parallel",),            # shard row tiles across TCs (v7x)
            vmem_limit_bytes=vmem_limit),
    )(x2, w)
    if m_pad != M:
        out2 = out2[:M]
    return out2.reshape(B, L, d_out)


def reference_qkv_linear(x, weights, *, forward_st=None, k=1.0, exp_eps=0.95,
                         kp_forward=False):
    """Pure-JAX float32 reference mirroring the PyTorch forward."""
    outs = [jnp.einsum('bld,od->blo', x, wi,
                       precision=jax.lax.Precision.HIGHEST) for wi in weights]
    out = jnp.concatenate(outs, axis=2) if len(outs) > 1 else outs[0]
    if not kp_forward:
        return out
    st = jnp.mean(x[:, :, :, None] * x[:, :, None, :], axis=(0, 1))
    eps = min(1.0 - 1.0 / k, exp_eps)
    new_forward_st = eps * forward_st + (1.0 - eps) * st
    return out, new_forward_st, k + 1.0


if __name__ == "__main__":
    # Shapes implied by the forward: x is (batch, length, dmodel).
    B, L, D = 2, 8, 32            # batch=2, seq=8, dmodel=32
    dk, dv = 8, 8
    exp_eps = 0.95

    key = jax.random.PRNGKey(0)
    kx, kq, kk, kv_ = jax.random.split(key, 4)
    x = jax.random.normal(kx, (B, L, D), dtype=jnp.float32)
    bound = 1.0 / jnp.sqrt(jnp.float32(D))
    wq = jax.random.uniform(kq, (dk, D), jnp.float32, -bound, bound)
    wk = jax.random.uniform(kk, (dk, D), jnp.float32, -bound, bound)
    wv = jax.random.uniform(kv_, (dv, D), jnp.float32, -bound, bound)
    forward_st0 = jnp.zeros((D, D), jnp.float32)

    # ---- q=True, kv=True, kp_forward=True -----------------------------------
    # f32 compute path: must match the PyTorch-equivalent reference tightly.
    out32, st32, k32 = qkv_linear_forward(
        x, (wq, wk, wv), forward_st=forward_st0, k=1.0, exp_eps=exp_eps,
        kp_forward=True, compute_dtype=jnp.float32, block_m=8)
    out32, st32 = jax.block_until_ready((out32, st32))

    ref_out, ref_st, ref_k = reference_qkv_linear(
        x, (wq, wk, wv), forward_st=forward_st0, k=1.0, exp_eps=exp_eps,
        kp_forward=True)

    assert out32.shape == (B, L, dk + dk + dv) and out32.dtype == jnp.float32
    assert jnp.allclose(out32, ref_out, atol=1e-4, rtol=1e-4), "f32 output mismatch"
    assert jnp.allclose(st32, ref_st, atol=1e-4, rtol=1e-4), "forward_st mismatch"
    assert float(k32) == float(ref_k), "k counter mismatch"

    # bf16 MXU path (default): same semantics within bf16 tolerance; the
    # statistic is still computed in f32 so it stays tight.
    outbf, stbf, _ = qkv_linear_forward(
        x, (wq, wk, wv), forward_st=forward_st0, k=1.0, exp_eps=exp_eps,
        kp_forward=True, compute_dtype=jnp.bfloat16, block_m=8)
    outbf, stbf = jax.block_until_ready((outbf, stbf))
    assert jnp.allclose(outbf, ref_out, atol=1e-1, rtol=1e-1), "bf16 output mismatch"
    assert jnp.allclose(stbf, ref_st, atol=1e-4, rtol=1e-4), "bf16-path forward_st mismatch"

    # ---- kv-only config (the module's default: kv=True, q=False) ------------
    out_kv = qkv_linear_forward(x, (wk, wv), kp_forward=False,
                                compute_dtype=jnp.float32, block_m=8)
    out_kv = jax.block_until_ready(out_kv)
    ref_kv = reference_qkv_linear(x, (wk, wv))
    assert out_kv.shape == (B, L, dk + dv)
    assert jnp.allclose(out_kv, ref_kv, atol=1e-4, rtol=1e-4), "kv-only mismatch"

    # ---- q-only with non-tile-divisible rows (exercises zero-padding) -------
    Lo = 6                                    # B*Lo = 12 rows, tile = 8 -> pad to 16
    xo = jax.random.normal(jax.random.PRNGKey(1), (B, Lo, D), dtype=jnp.float32)
    out_q = qkv_linear_forward(xo, (wq,), kp_forward=False,
                               compute_dtype=jnp.float32, block_m=8)
    out_q = jax.block_until_ready(out_q)
    ref_q = reference_qkv_linear(xo, (wq,))
    assert out_q.shape == (B, Lo, dk)
    assert jnp.allclose(out_q, ref_q, atol=1e-4, rtol=1e-4), "q-only / padding mismatch"

    print("KERNEL_OK")
</pallas_src>

<mosaic_0001>
module attributes {stable_mosaic.version = 11 : i64} {
  func.func @_qkv_kfac_kernel(%arg0: i32, %arg1: memref<8x32xf32, #tpu.memory_space<vmem>>, %arg2: memref<24x32xf32, #tpu.memory_space<vmem>>, %arg3: memref<8x24xf32, #tpu.memory_space<vmem>>, %arg4: memref<32x32xf32, #tpu.memory_space<vmem>>) attributes {dimension_semantics = [#tpu.dimension_semantics<arbitrary>], iteration_bounds = array<i64: 2>, scalar_prefetch = 0 : i64, scratch_operands = 0 : i64, tpu.core_type = #tpu.core_type<tc>, window_params = [{transform_indices = @transform_0, window_bounds = array<i64: 8, 32>}, {pipeline_mode = #tpu.pipeline_mode<synchronous>, transform_indices = @transform_1, window_bounds = array<i64: 24, 32>}, {transform_indices = @transform_2, window_bounds = array<i64: 8, 24>}, {pipeline_mode = #tpu.pipeline_mode<synchronous>, transform_indices = @transform_3, window_bounds = array<i64: 32, 32>}]} {
    %c0 = arith.constant 0 : index
    %c0_0 = arith.constant 0 : index
    %0 = vector.load %arg1[%c0, %c0_0] : memref<8x32xf32, #tpu.memory_space<vmem>>, vector<8x32xf32>
    %c0_1 = arith.constant 0 : index
    %c0_2 = arith.constant 0 : index
    %1 = vector.load %arg2[%c0_1, %c0_2] : memref<24x32xf32, #tpu.memory_space<vmem>>, vector<24x32xf32>
    %cst = arith.constant dense<0.000000e+00> : vector<8x24xf32>
    %2 = tpu.matmul %0, %1, %cst {dimension_numbers = #tpu.dot_dimension_numbers<[1], [1], [0], [0], [0, 0, 1, 0], [], []>} : vector<8x32xf32>, vector<24x32xf32>, vector<8x24xf32> -> vector<8x24xf32>
    %c0_3 = arith.constant 0 : index
    %c0_4 = arith.constant 0 : index
    %3 = vector.load %arg3[%c0_3, %c0_4] : memref<8x24xf32, #tpu.memory_space<vmem>>, vector<8x24xf32>
    tpu.vector_store %arg3[%c0_3, %c0_4], %2 {strides = array<i32>} : memref<8x24xf32, #tpu.memory_space<vmem>>, vector<8x24xf32>,
    %cst_5 = arith.constant dense<0.000000e+00> : vector<32x32xf32>
    %4 = tpu.matmul %0, %0, %cst_5 {dimension_numbers = #tpu.dot_dimension_numbers<[0], [0], [1], [1], [0, 1, 1, 1], [], []>} : vector<8x32xf32>, vector<8x32xf32>, vector<32x32xf32> -> vector<32x32xf32>
    %c0_i32 = arith.constant 0 : i32
    %5 = arith.cmpi eq, %arg0, %c0_i32 : i32
    %6 = arith.extui %5 : i1 to i32
    %c0_i32_6 = arith.constant 0 : i32
    %7 = arith.cmpi ne, %6, %c0_i32_6 : i32
    scf.if %7 {
      %c0_10 = arith.constant 0 : index
      %c0_11 = arith.constant 0 : index
      %14 = vector.load %arg4[%c0_10, %c0_11] : memref<32x32xf32, #tpu.memory_space<vmem>>, vector<32x32xf32>
      tpu.vector_store %arg4[%c0_10, %c0_11], %4 {strides = array<i32>} : memref<32x32xf32, #tpu.memory_space<vmem>>, vector<32x32xf32>,
    } else {
    }
    %c0_i32_7 = arith.constant 0 : i32
    %8 = arith.cmpi sgt, %arg0, %c0_i32_7 : i32
    %9 = arith.extui %8 : i1 to i32
    %c0_i32_8 = arith.constant 0 : i32
    %10 = arith.cmpi ne, %9, %c0_i32_8 : i32
    scf.if %10 {
      %c0_10 = arith.constant 0 : index
      %c0_11 = arith.constant 0 : index
      %14 = vector.load %arg4[%c0_10, %c0_11] : memref<32x32xf32, #tpu.memory_space<vmem>>, vector<32x32xf32>
      %15 = arith.addf %14, %4 : vector<32x32xf32>
      %c0_12 = arith.constant 0 : index
      %c0_13 = arith.constant 0 : index
      %16 = vector.load %arg4[%c0_12, %c0_13] : memref<32x32xf32, #tpu.memory_space<vmem>>, vector<32x32xf32>
      tpu.vector_store %arg4[%c0_12, %c0_13], %15 {strides = array<i32>} : memref<32x32xf32, #tpu.memory_space<vmem>>, vector<32x32xf32>,
    } else {
    }
    %c1_i32 = arith.constant 1 : i32
    %11 = arith.cmpi eq, %arg0, %c1_i32 : i32
    %12 = arith.extui %11 : i1 to i32
    %c0_i32_9 = arith.constant 0 : i32
    %13 = arith.cmpi ne, %12, %c0_i32_9 : i32
    scf.if %13 {
      %c0_10 = arith.constant 0 : index
      %c0_11 = arith.constant 0 : index
      %14 = vector.load %arg4[%c0_10, %c0_11] : memref<32x32xf32, #tpu.memory_space<vmem>>, vector<32x32xf32>
      %cst_12 = arith.constant 6.250000e-02 : f32
      %15 = vector.broadcast %cst_12 : f32 to vector<32x32xf32>
      %16 = arith.mulf %14, %15 : vector<32x32xf32>
      %c0_13 = arith.constant 0 : index
      %c0_14 = arith.constant 0 : index
      %17 = vector.load %arg4[%c0_13, %c0_14] : memref<32x32xf32, #tpu.memory_space<vmem>>, vector<32x32xf32>
      tpu.vector_store %arg4[%c0_13, %c0_14], %16 {strides = array<i32>} : memref<32x32xf32, #tpu.memory_space<vmem>>, vector<32x32xf32>,
    } else {
    }
    return
  }
  func.func @transform_0(%arg0: i32) -> (i32, i32) {
    %c0_i32 = arith.constant 0 : i32
    %c0_i32_0 = arith.constant 0 : i32
    return %arg0, %c0_i32 : i32, i32
  }
  func.func @transform_1(%arg0: i32) -> (i32, i32) {
    %c0_i32 = arith.constant 0 : i32
    %c0_i32_0 = arith.constant 0 : i32
    %c0_i32_1 = arith.constant 0 : i32
    return %c0_i32, %c0_i32_0 : i32, i32
  }
  func.func @transform_2(%arg0: i32) -> (i32, i32) {
    %c0_i32 = arith.constant 0 : i32
    %c0_i32_0 = arith.constant 0 : i32
    return %arg0, %c0_i32 : i32, i32
  }
  func.func @transform_3(%arg0: i32) -> (i32, i32) {
    %c0_i32 = arith.constant 0 : i32
    %c0_i32_0 = arith.constant 0 : i32
    %c0_i32_1 = arith.constant 0 : i32
    return %c0_i32, %c0_i32_0 : i32, i32
  }
}

</mosaic_0001>

<bundles_post_ra>
// kernel: tpu_custom_call.1
= control target key start
LH: loop header
LB: loop body
LE: loop exit
PB: predicated region body
PF: predicated region fallthrough
CT: control target
= control target key end

     0   :  { %9 = vsyncpa [#allocation3], 0  ;;  %s1137_s0 = inlined_call_operand.hbm [shape: f32[16,32], index: 0, kind: input, shape index: {}]   ;;  %s1138_s1 = inlined_call_operand.hbm [shape: f32[24,32], index: 1, kind: input, shape index: {}]   ;;  %s1139_s2 = inlined_call_operand.hbm [shape: f32[16,24], index: 2, kind: output, shape index: {0}]   ;;  %s1140_s3 = inlined_call_operand.hbm [shape: f32[32,32], index: 3, kind: output, shape index: {1}]  }
   0x1   :  { %11 = vsyncpa [#allocation3 + $0x1], 0 }
   0x2   :  { %12 = vsyncpa [#allocation6], 0 }
   0x3   :  { %13 = vsyncpa [#allocation4], 0 }
   0x4   :  { %15 = vsyncpa [#allocation4 + $0x1], 0 }
   0x5   :  { %16 = vsyncpa [#allocation9], 0  ;;  %s896_s12 = smov 0   ;;  %s898_s13 = smov 0  }
   0x6   :  { %s900_s14 = smov 0   ;;  %s902_s15 = smov 0  }
   0x7 LB: > { %s917_s16 = sadd.s32 4294967295, %s863_s15   ;;  %s577_s17 = sadd.s32 4294967294, %s863_s15   ;;  %s863_s15 = sphi %s902_s15, %s1166_s15   ;;  %s859_s14 = sphi %s900_s14, %s1165_s14   ;;  %s855_s13 = sphi %s898_s13, %s1164_s13   ;;  %s851_s12 = sphi %s896_s12, %s1163_s12  }
   0x8   : > { %p42_p0 = scmp.ne.s32.totalorder %s855_s13, %s851_s12  ;;  %p1141_p1 = scmp.eq.s32.totalorder %s917_s16, 0 }
   0x9   : > { %p93_p3 = scmp.eq.s32.totalorder %s577_s17, 1  ;;  %p578_p5 = scmp.ge.s32.totalorder %s863_s15, 1 }
   0xa   : > { %p926_p4 = por %p1141_p1, %p42_p0  ;;  %p121_p7 = scmp.lt.s32.totalorder %s863_s15, 3 }
   0xb   : > { %p931_p6 = por %p93_p3, %p42_p0  ;;  %s865_s21 = smov [#allocation5]  }
   0xc   : > { %s1144_s18 = scalar_select %p926_p4, 1, 0 }
   0xd   : > { %s1145_s19 = scalar_select %p931_p6, 1, 0 }
   0xe   : > { %p937_p9 = pnand %p578_p5, %p121_p7  ;;  %s133_s22 = sshll.u32 %s865_s21, 4  ;;  %s941_s22 = int_to_ptr.vmem [resolvable:$true] %s133_s22 }
   0xf   : > { %s953_s24 = sadd.s32 1, %s863_s15   ;;  %s29_s25 = sadd.s32 1, %s859_s14 }
  0x10   : > { %s1146_s20 = scalar_select %p937_p9, 1, 0 }
  0x11   : > { %p646_p10 = pneg %p937_p9  ;;  %s26_s26 = ssub.s32 %s863_s15, %s953_s24 }
  0x12   : > { %s705_s29 = scalar_lea.hbm %s1138_s1, 384 }
  0x13   : > { %p948_p12 = pnand %p646_p10, %p1141_p1  ;;  %p706_p13 = scmp.ne.s32.totalorder %s1138_s1, %s705_s29 }
  0x14   : > { %p712_p7 = scmp.lt.u32.totalorder %s705_s29, %s1138_s1 }
  0x15   : > { %p707_p0 = pneg %p948_p12 }
  0x17   : > { %p708_p3 = pnand %p707_p0, %p706_p13 }
  0x19   : > { %p709_p5 = pneg %p708_p3 }
  0x1b   : > { %p714_p10 = pnand %p712_p7, %p709_p5 }
  0x1d   : > { %717 = shalt.err (!%p714_p10)
}
  0x1e   : > { %s718_s7 = scalar_lea.vmem %s941_s22, 384  ;;  %p726_p2 = scmp.lt.s32.totalorder %s941_s22, %s941_s22 }
  0x1f   : > { %p719_p11 = scmp.ne.s32.totalorder %s941_s22, %s718_s7  ;;  %p727_p6 = scmp.lt.s32.totalorder %s718_s7, %s718_s7 }
  0x21   : > { %p721_p8 = pnand %p719_p11, %p707_p0  ;;  %p728_p4 = por %p727_p6, %p726_p2 }
  0x23   : > { %p722_p1 = pneg %p721_p8 }
  0x25   : > { %p729_p9 = pnand %p728_p4, %p722_p1 }
  0x27   : > { %732 = shalt.err (!%p729_p9)
}
  0x28   : > { %s866_s8 = smov 128   ;;  %s867_s9 = smov 8  }
  0x29   : > { %649 = dma.hbm_to_vmem [thread:$0]  (!%p948_p12), %s1138_s1, 384, %s941_s22, [#allocation6], %s866_s8, %s866_s8, %s867_s9  }
  0x2a   : > { %p27_p2 = scmp.eq.s32.totalorder %s26_s26, 0  ;;  %p36_p1 = scmp.ne.s32.totalorder %s859_s14, %s855_s13 }
  0x2b   : > { %p37_p4 = scmp.eq.s32.totalorder %s863_s15, 0  ;;  %p659_p6 = scmp.lt.s32.totalorder %s863_s15, 2 }
  0x2c   : > { %s984_s17 = scalar_select %p27_p2, %s859_s14, %s29_s25  }
  0x2d   : > { %p38_p8 = por %p37_p4, %p36_p1  ;;  %p1148_p9 = scmp.eq.s32.totalorder %s917_s16, 1 }
  0x2e   : > { %s147_s27 = sand.u32 1, %s859_s14   ;;  %s582_s28 = sshll.u32 %s863_s15, 7 }
  0x2f   : > { %p988_p11 = por %p1148_p9, %p36_p1  ;;  %s581_s29 = sshll.u32 %s147_s27, 3 }
  0x30   : > { %s997_s4 = scalar_lea.hbm %s1137_s0, %s582_s28  ;;  %s151_s22 = scalar_lea.vmem [#allocation2], %s581_s29 }
  0x31   : > { %s158_s25 = sshll.u32 %s151_s22, 4  ;;  %p999_p12 = pnand %p659_p6, %p38_p8  ;;  %s1003_s25 = int_to_ptr.vmem [resolvable:$true] %s158_s25 }
  0x32   : > { %s148_s5 = scalar_lea.sflag [#allocation3], %s147_s27  ;;  %s733_s6 = scalar_lea.hbm %s997_s4, 128 }
  0x33   : > { %p734_p13 = scmp.ne.s32.totalorder %s997_s4, %s733_s6  ;;  %p735_p0 = pneg %p999_p12 }
  0x34   : > { %s738_s9 = scalar_lea.hbm %s1137_s0, 256  ;;  %p739_p7 = scmp.lt.u32.totalorder %s997_s4, %s1137_s0 }
  0x35   : > { %p736_p3 = pnand %p735_p0, %p734_p13  ;;  %p740_p10 = scmp.lt.u32.totalorder %s738_s9, %s733_s6 }
  0x36   : > { %p742_p1 = scmp.lt.u32.totalorder %s733_s6, %s997_s4 }
  0x37   : > { %p737_p5 = pneg %p736_p3  ;;  %p741_p2 = por %p740_p10, %p739_p7 }
  0x39   : > { %p743_p4 = por %p742_p1, %p741_p2 }
  0x3b   : > { %p744_p6 = pnand %p743_p4, %p737_p5 }
  0x3d   : > { %747 = shalt.err (!%p744_p6)
}
  0x3e   : > { %s748_s27 = scalar_lea.vmem %s1003_s25, 128  ;;  %s868_s28 = smov [#allocation2]  }
  0x3f   : > { %p749_p8 = scmp.ne.s32.totalorder %s1003_s25, %s748_s27  ;;  %s753_s29 = sshll.u32 %s868_s28, 4  ;;  %s754_s29 = int_to_ptr.vmem [resolvable:$false] %s753_s29 }
  0x40   : > { %s755_s23 = scalar_lea.vmem %s754_s29, 256  ;;  %p756_p3 = scmp.lt.s32.totalorder %s1003_s25, %s754_s29 }
  0x41   : > { %p751_p9 = pnand %p749_p8, %p735_p0  ;;  %p757_p7 = scmp.lt.s32.totalorder %s755_s23, %s748_s27 }
  0x43   : > { %p752_p13 = pneg %p751_p9  ;;  %p758_p10 = por %p757_p7, %p756_p3 }
  0x45   : > { %p759_p2 = pnand %p758_p10, %p752_p13 }
  0x47   : > { %762 = shalt.err (!%p759_p2)
}
  0x48   : > { %653 = dma.hbm_to_vmem [thread:$0]  (!%p999_p12), %s997_s4, 128, %s1003_s25, %s148_s5  }
  0x49   : > { %p1151_p5 = scmp.ne.s32.totalorder %s1146_s20, 0 }
  0x4a   : > { %s1033_s30 = sand.u32 (!%p1151_p5), 1, %s855_s13   ;;  %p1152_p0 = scmp.ne.s32.totalorder (!%p1151_p5), %s1144_s18, 0 }
  0x4b   : > { %167 = sbr.rel (%p1151_p5) target bundleno = 515 (0x203), region = 28  ;;  %s584_s22 = sshll.u32 (!%p1151_p5), %s1033_s30, 3 }
  0x4c   : > { %s170_s6 = scalar_lea.sflag (!%p1151_p5), [#allocation3], %s1033_s30  ;;  %s173_s7 = scalar_lea.vmem (!%p1151_p5), [#allocation2], %s584_s22 }
  0x52   : > { %834 = dma.done.wait (%p1152_p0), %s170_s6, 128  }
  0x53   : > { %836 = vsyncadd (%p1152_p0), %s170_s6, 4294967168  ;;  %p1153_p12 = scmp.eq.s32.totalorder %s917_s16, 0 }
  0x55   : > { %838 = dma.done.wait (%p1153_p12), [#allocation6], 384   ;;  %p1154_p1 = pmov %p1153_p12 }
  0x56   : > { %v869_v0 = vmov 0.0|0.0   ;;  %v200_v1 = vld [vmem:[%s173_s7] sm:$0xff]  ;;  %v201_v2 = vld [vmem:[#allocation5] sm:$0xff]  ;;  %v202_v3 = vld [vmem:[#allocation5 + $0x8] sm:$0xff]  ;;  %vm204_vm0 = vcmask 261120   ;;  %v870_v5 = vmov 0.0  }
  0x57   : > { %840 = vsyncadd (%p1154_p1), [#allocation6], 4294966912  ;;  %630 = vmatprep.subr.bf16.mxu0 %v869_v0  ;;  %289 = vxpose.xlu0.b32.start.end [1/1] (short) (narrow) %v200_v1, 32  ;;  %v631_v4 = vpack.c.bf16 %v202_v3, %v201_v2  ;;  %v203_v6 = vld [vmem:[#allocation5 + $0x10] sm:$0xff]  ;;  %vm871_vm2 = vmmov 0   ;;  %vm321_vm3 = vcmask 64512  }
  0x58   : > { %vm632_vm1 = vmpackc.low %vm204_vm0, %vm204_vm0  ;;  %622 = vmatprep.subr.mxu1 %v200_v1  ;;  %619 = vmatprep.mubr.msk.f32.mxu0 %vm871_vm2, %v870_v5  ;;  %vm287_vm4 = vcmask 195584   ;;  %s1053_s18 = scalar_lea.vmem [#allocation7], %s584_s22  ;;  %p1155_p4 = scmp.ne.s32.totalorder %s917_s16, 0 }
  0x59   : > { %623 = vmatpush3.msra.mxu1 %v200_v1  ;;  %633 = vmatpush3.bf16.xpose.msk.msra.mxu0 %vm632_vm1, %v631_v4 }
  0x5a   : > { %617 = vmatprep.subr.mxu0 %v870_v5 }
  0x61   : > { %618 = vmatpush3.xpose.msk.msra.mxu0 %vm204_vm0, %v203_v6 }
  0x64   : > { %620 = vmatmul.mubr.msk.f32.vlgmr.msra.gmra.mrb[0].mxu0 %vm204_vm0, %v200_v1 }
  0xd7   : > { %v305_v7 = vpop.trf.xlu0 }
  0xd8   : > { %624 = vmatprep.mubr.msk.f32.mxu1 %vm321_vm3, %v305_v7 }
  0xdb   : > { %v306_v8 = vpop.trf.xlu0 }
  0xdc   : > { %625 = vmatmul.mubr.msk.f32.vlgmr.msra.gmra.mrb[0].mxu1 %vm321_vm3, %v306_v8 }
  0xdf   : > { %v307_v9 = vpop.trf.xlu0 }
  0xe0   : > { %627 = vmatprep.mubr.msk.f32.mxu1 %vm321_vm3, %v307_v9 }
  0xe3   : > { %v308_v10 = vpop.trf.xlu0 }
  0xe4   : > { %628 = vmatmul.mubr.msk.f32.gmra.mrb[2].mxu1 %vm321_vm3, %v308_v10 }
 0x137   : > { %v283_v11 = vpop.f32.mrb[0].mxu0 }
 0x138   : > { %288 = vst.msk [vmem:[%s1053_s18] sm:$0xff] %vm287_vm4, %v283_v11  ;;  %v621_v12 = vpop.f32.mrb[1].mxu0 }
 0x1af   : > { %v626_v13 = vpop.f32.mrb[0].mxu1 }
 0x1b0   : > { %v400_v14 = vpop.f32.mrb[1].mxu1  ;;  %424 = vst.msk [vmem:[#allocation8 + $0x8] sm:$0xff] (!%p1155_p4), %vm204_vm0, %v626_v13 }
 0x1b1   : > { %423 = vst.msk [vmem:[#allocation8] sm:$0xff] (!%p1155_p4), %vm204_vm0, %v400_v14 }
 0x1b2   : > { %422 = sbr.rel (%p1155_p4) target bundleno = 442 (0x1ba), region = 40 }
 0x1b7   : > { %v629_v15 = vpop.f32.mrb[2].mxu1 }
 0x1b8   : > { %v410_v16 = vpop.f32.mrb[3].mxu1  ;;  %426 = vst.msk [vmem:[#allocation8 + $0x18] sm:$0xff] (!%p1155_p4), %vm204_vm0, %v629_v15 }
 0x1b9   : > { %425 = vst.msk [vmem:[#allocation8 + $0x10] sm:$0xff] %vm204_vm0, %v410_v16 }
 0x1ba PF: > { %p596_p6 = scmp.le.s32.totalorder %s917_s16, 0 }
 0x1bb   : > { %v431_v17 = vld [vmem:[#allocation8] sm:$0xff] (!%p596_p6)  ;;  %v432_v18 = vld [vmem:[#allocation8 + $0x8] sm:$0xff] (!%p596_p6) }
 0x1bc   : > { %430 = sbr.rel (%p596_p6) target bundleno = 452 (0x1c4), region = 44  ;;  %v435_v20 = vadd.f32 (!%p596_p6), %v431_v17, %v400_v14  ;;  %v436_v21 = vadd.f32 (!%p596_p6), %v626_v13, %v432_v18 }
 0x1be   : > { %439 = vst.msk [vmem:[#allocation8] sm:$0xff] (!%p596_p6), %vm204_vm0, %v435_v20  ;;  %440 = vst.msk [vmem:[#allocation8 + $0x8] sm:$0xff] (!%p596_p6), %vm204_vm0, %v436_v21 }
 0x1c0   : > { %v433_v19 = vld [vmem:[#allocation8 + $0x10] sm:$0xff] (!%p596_p6)  ;;  %v434_v23 = vld [vmem:[#allocation8 + $0x18] sm:$0xff] (!%p596_p6) }
 0x1c1   : > { %v437_v22 = vadd.f32 (!%p596_p6), %v433_v19, %v410_v16  ;;  %v438_v24 = vadd.f32 (!%p596_p6), %v629_v15, %v434_v23 }
 0x1c3   : > { %441 = vst.msk [vmem:[#allocation8 + $0x10] sm:$0xff] %vm204_vm0, %v437_v22  ;;  %442 = vst.msk [vmem:[#allocation8 + $0x18] sm:$0xff] %vm204_vm0, %v438_v24 }
 0x1c4 PF: > { %p597_p8 = scmp.ne.s32.totalorder %s917_s16, 1 }
 0x1c6   : > { %446 = sbr.rel (%p597_p8) target bundleno = 462 (0x1ce), region = 48  ;;  %v447_v25 = vld [vmem:[#allocation8] sm:$0xff] (!%p597_p8)  ;;  %v448_v26 = vld [vmem:[#allocation8 + $0x8] sm:$0xff] (!%p597_p8) }
 0x1c7   : > { %v451_v28 = vmul.f32 (!%p597_p8), 0.0625, %v447_v25  ;;  %v452_v29 = vmul.f32 (!%p597_p8), 0.0625, %v448_v26 }
 0x1c9   : > { %455 = vst.msk [vmem:[#allocation8] sm:$0xff] (!%p597_p8), %vm204_vm0, %v451_v28  ;;  %456 = vst.msk [vmem:[#allocation8 + $0x8] sm:$0xff] (!%p597_p8), %vm204_vm0, %v452_v29 }
 0x1ca   : > { %v449_v27 = vld [vmem:[#allocation8 + $0x10] sm:$0xff] (!%p597_p8)  ;;  %v450_v31 = vld [vmem:[#allocation8 + $0x18] sm:$0xff] (!%p597_p8) }
 0x1cb   : > { %v453_v30 = vmul.f32 (!%p597_p8), 0.0625, %v449_v27  ;;  %v454_v32 = vmul.f32 (!%p597_p8), 0.0625, %v450_v31 }
 0x1cd   : > { %457 = vst.msk [vmem:[#allocation8 + $0x10] sm:$0xff] %vm204_vm0, %v453_v30  ;;  %458 = vst.msk [vmem:[#allocation8 + $0x18] sm:$0xff] %vm204_vm0, %v454_v32 }
 0x1ce PF: > { %s599_s20 = sshll.u32 %s917_s16, 7  ;;  %s473_s5 = sshll.u32 %s1053_s18, 4  ;;  %s474_s5 = int_to_ptr.vmem [resolvable:$true] %s473_s5 }
 0x1cf   : > { %s1076_s26 = scalar_lea.hbm %s1139_s2, %s599_s20  ;;  %s460_s8 = scalar_lea.sflag [#allocation4], %s1033_s30 }
 0x1d0   : > { %s763_s9 = scalar_lea.vmem %s474_s5, 128  ;;  %s872_s10 = smov [#allocation7]  }
 0x1d1   : > { %p764_p9 = scmp.ne.s32.totalorder %s474_s5, %s763_s9  ;;  %s767_s11 = sshll.u32 %s872_s10, 4  ;;  %s768_s11 = int_to_ptr.vmem [resolvable:$false] %s767_s11 }
 0x1d2   : > { %s769_s27 = scalar_lea.vmem %s768_s11, 256  ;;  %p770_p7 = scmp.lt.s32.totalorder %s474_s5, %s768_s11 }
 0x1d3   : > { %p765_p13 = pnand %p764_p9, %p988_p11  ;;  %p771_p10 = scmp.lt.s32.totalorder %s769_s27, %s763_s9 }
 0x1d5   : > { %p766_p3 = pneg %p765_p13  ;;  %p772_p2 = por %p771_p10, %p770_p7 }
 0x1d7   : > { %p773_p5 = pnand %p772_p2, %p766_p3 }
 0x1d9   : > { %776 = shalt.err (!%p773_p5)
}
 0x1da   : > { %s777_s28 = scalar_lea.hbm %s1076_s26, 128  ;;  %s781_s30 = scalar_lea.hbm %s1139_s2, 256 }
 0x1db   : > { %p778_p0 = scmp.ne.s32.totalorder %s1076_s26, %s777_s28  ;;  %p782_p4 = scmp.lt.u32.totalorder %s1076_s26, %s1139_s2 }
 0x1dc   : > { %p783_p6 = scmp.lt.u32.totalorder %s781_s30, %s777_s28  ;;  %p785_p9 = scmp.lt.u32.totalorder %s777_s28, %s1076_s26 }
 0x1dd   : > { %p779_p12 = pnand %p778_p0, %p988_p11 }
 0x1de   : > { %p784_p8 = por %p783_p6, %p782_p4 }
 0x1df   : > { %p780_p1 = pneg %p779_p12 }
 0x1e0   : > { %p786_p13 = por %p785_p9, %p784_p8 }
 0x1e2   : > { %p787_p3 = pnand %p786_p13, %p780_p1 }
 0x1e4   : > { %790 = shalt.err (!%p787_p3)
}
 0x1e5   : > { %640 = dma.vmem_to_hbm [thread:$0]  (%p988_p11), %s474_s5, 128, %s1076_s26, %s460_s8  }
 0x1e6   : > { %s873_s7 = smov [#allocation8]   ;;  %p1156_p10 = scmp.eq.s32.totalorder %s917_s16, 1 }
 0x1e7   : > { %s483_s18 = sshll.u32 %s873_s7, 4  ;;  %s484_s18 = int_to_ptr.vmem [resolvable:$true] %s483_s18 }
 0x1e8   : > { %s791_s20 = scalar_lea.vmem %s484_s18, 512  ;;  %p798_p0 = scmp.lt.s32.totalorder %s484_s18, %s484_s18 }
 0x1e9   : > { %p792_p7 = scmp.ne.s32.totalorder %s484_s18, %s791_s20  ;;  %p799_p12 = scmp.lt.s32.totalorder %s791_s20, %s791_s20 }
 0x1eb   : > { %p793_p2 = pnand %p792_p7, %p1156_p10  ;;  %p800_p4 = por %p799_p12, %p798_p0 }
 0x1ed   : > { %p794_p5 = pneg %p793_p2 }
 0x1ef   : > { %p801_p6 = pnand %p800_p4, %p794_p5 }
 0x1f1   : > { %804 = shalt.err (!%p801_p6)
}
 0x1f2   : > { %s805_s21 = scalar_lea.hbm %s1140_s3, 512  ;;  %p1157_p1 = pmov %p1156_p10 }
 0x1f3   : > { %p806_p11 = scmp.ne.s32.totalorder %s1140_s3, %s805_s21  ;;  %p811_p13 = scmp.lt.u32.totalorder %s805_s21, %s1140_s3 }
 0x1f5   : > { %p807_p8 = pnand %p806_p11, %p1157_p1 }
 0x1f7   : > { %p808_p9 = pneg %p807_p8 }
 0x1f9   : > { %p813_p3 = pnand %p811_p13, %p808_p9 }
 0x1fb   : > { %816 = shalt.err (!%p813_p3)
}
 0x1fc   : > { %s874_s10 = smov 128   ;;  %s875_s11 = smov 8  }
 0x1fd   : > { %p1158_p7 = pmov %p1157_p1  ;;  %p1159_p10 = pmov %p1157_p1 }
 0x1ff   : > { %642 = dma.vmem_to_hbm [thread:$0]  (%p1158_p7), %s484_s18, 512, %s1140_s3, [#allocation9], %s874_s10, %s874_s10, %s875_s11  }
 0x200   : > { %842 = dma.done.wait (%p1159_p10), [#allocation9], 512   ;;  %p1160_p2 = pmov %p1157_p1 }
 0x202   : > { %844 = vsyncadd (%p1160_p2), [#allocation9], 4294966784 }
 0x203 PF: > { %s502_s29 = sand.u32 1, %s851_s12   ;;  %p1161_p5 = scmp.ne.s32.totalorder %s1145_s19, 0 }
 0x204   : > { %p1162_p0 = scmp.ge.s32.totalorder %s863_s15, 2  ;;  %s503_s23 = scalar_lea.sflag [#allocation4], %s502_s29 }
 0x206   : > { %p655_p12 = pnand %p1162_p0, %p1161_p5 }
 0x208   : > { %846 = dma.done.wait (!%p655_p12), %s503_s23, 128  }
 0x209   : > { %848 = vsyncadd (!%p655_p12), %s503_s23, 4294967168  ;;  %p19_p4 = scmp.ge.s32.totalorder %s953_s24, 4   ;;  %s1163_s12 = smov %s855_s13 }
 0x20a   : > { %s1164_s13 = smov %s859_s14  ;;  %s1165_s14 = smov %s984_s17 }
 0x20b   : > { %s1166_s15 = smov %s953_s24  ;;  %21 = sbr.rel (!%p19_p4) target bundleno = 7 (0x7), region = 97 }
 0x212   :  { %508 = vsyncpa [#allocation3], 1 }
 0x213   :  { %510 = vsyncpa [#allocation3 + $0x1], 1 }
 0x214   :  { %511 = vsyncpa [#allocation6], 1 }
 0x215   :  { %512 = vsyncpa [#allocation4], 1 }
 0x216   :  { %514 = vsyncpa [#allocation4 + $0x1], 1 }
 0x217   :  { %515 = vsyncpa [#allocation9], 1 }

</bundles_post_ra>
